<compile_context>
chip_gen: v7x
topology: tpu7x:2x2x1
jax: 0.10.0
libtpu: 0.0.40
codegen_flags: <defaults>
</compile_context>

<pallas_src>
import functools

import jax
import jax.numpy as jnp
from jax.experimental import pallas as pl
from jax.experimental.pallas import tpu as pltpu


def _round_up(x, m):
    return ((x + m - 1) // m) * m


def _lse_rows_kernel(x_ref, out_ref, m_sc, l_sc, *, valid_tail):
    """Per-row online logsumexp over class tiles.

    x_ref:   (TN, TC) logits tile (input dtype; upcast to f32 in-kernel)
    out_ref: (TN, 128) f32 per-row LSE broadcast across lanes (lane-dense)
    m_sc/l_sc: (TN, 1) f32 running max / running sum(exp(x - m))
    valid_tail: static Python int; number of valid columns in the LAST class
                tile (0 => last tile is full, no masking code is emitted).
    """
    kc = pl.program_id(1)
    last = pl.num_programs(1) - 1

    @pl.when(kc == 0)
    def _():
        m_sc[...] = jnp.full(m_sc.shape, -jnp.inf, m_sc.dtype)
        l_sc[...] = jnp.zeros(l_sc.shape, l_sc.dtype)

    # Keep HBM traffic in the input dtype (bf16 halves DMA bytes); do LSE math
    # in f32.  (Optional: bf16 exp on v6e/v7x for EUP-bound cases.)
    x = x_ref[...].astype(jnp.float32)

    def update(xv):
        m_blk = jnp.max(xv, axis=-1, keepdims=True)
        m_new = jnp.maximum(m_sc[...], m_blk)
        alpha = jnp.exp(m_sc[...] - m_new)
        p_sum = jnp.sum(jnp.exp(xv - m_new), axis=-1, keepdims=True)
        l_sc[...] = alpha * l_sc[...] + p_sum
        m_sc[...] = m_new

    if valid_tail:  # static: only emitted when C % TC != 0
        # Only the ragged last class tile pays for the iota/compare/select.
        @pl.when(kc != last)
        def _():
            update(x)

        @pl.when(kc == last)
        def _():
            col = jax.lax.broadcasted_iota(jnp.int32, x.shape, 1)
            update(jnp.where(col < valid_tail, x, -jnp.inf))
    else:
        update(x)

    @pl.when(kc == last)
    def _():
        lse = m_sc[...] + jnp.log(l_sc[...])                  # (TN, 1)
        out_ref[...] = jnp.broadcast_to(lse, out_ref.shape)   # lane-dense store


def ce_with_reg_loss(logits, target, loss_reg, *, tn=None, tc_max=None):
    """logits: (N, C) float (f32/bf16); target: (N,) int; loss_reg: scalar.
    Returns scalar f32 = mean cross-entropy + loss_reg."""
    n, c = logits.shape
    itemsize = jnp.dtype(logits.dtype).itemsize
    row_align = max(8, 32 // itemsize)          # 8 f32, 16 bf16, 32 int8/fp8

    # ---- class tile: full C if it fits, else 128-aligned tiles (online LSE) ----
    if tc_max is None:
        tc_max = max(128, (16384 // itemsize) // 128 * 128)   # ~16 KiB of classes/row
    if c <= tc_max:
        tc = c
    else:
        tc = max(128, (tc_max // 128) * 128)
    n_ctiles = pl.cdiv(c, tc)
    tail = c % tc                               # 0 => last class tile is full

    # ---- row tile: ~4 MiB logits block to amortize per-step overhead, but keep
    #      >= ~4 row tiles so the v7x megacore "parallel" axis can split ----
    if tn is None:
        target_block_bytes = 4 << 20
        tn = max(row_align,
                 (target_block_bytes // (tc * itemsize)) // row_align * row_align)
    tn = _round_up(max(int(tn), 1), row_align)
    tn = min(tn, _round_up(pl.cdiv(n, 4), row_align), _round_up(n, row_align))
    tn = max(tn, row_align)
    n_rtiles = pl.cdiv(n, tn)

    grid = (n_rtiles, n_ctiles)

    block_bytes = tn * tc * itemsize
    vmem_limit = int(min(48 << 20,
                         max(32 << 20, 2 * block_bytes + 2 * tn * 128 * 4 + (4 << 20))))

    cost = pl.CostEstimate(
        flops=int(5 * n * c),
        transcendentals=int(n * c),
        bytes_accessed=int(n * c * itemsize + n_rtiles * tn * 128 * 4),
    )

    lse_pad = pl.pallas_call(
        functools.partial(_lse_rows_kernel, valid_tail=tail),
        out_shape=jax.ShapeDtypeStruct((n_rtiles * tn, 128), jnp.float32),
        grid_spec=pltpu.PrefetchScalarGridSpec(
            num_scalar_prefetch=0,
            grid=grid,
            in_specs=[pl.BlockSpec((tn, tc), lambda i, k: (i, k))],
            out_specs=pl.BlockSpec((tn, 128), lambda i, k: (i, 0)),
            scratch_shapes=[pltpu.VMEM((tn, 1), jnp.float32),
                            pltpu.VMEM((tn, 1), jnp.float32)],
        ),
        compiler_params=pltpu.CompilerParams(
            dimension_semantics=("parallel", "arbitrary"),
            vmem_limit_bytes=vmem_limit),
        cost_estimate=cost,
    )(logits)

    lse = lse_pad[:n, 0]                        # (n,) per-row logsumexp (f32)
    tgt = target.astype(jnp.int32)
    # O(N)-element gather in the wrapper keeps iota/compare/select off the
    # kernel's critical VPU/EUP path (matters on v7x / bf16).
    # NOTE: out-of-range targets clamp here; torch CrossEntropyLoss would error.
    x_t = jnp.take_along_axis(logits, tgt[:, None], axis=-1)[:, 0].astype(jnp.float32)
    ce_mean = jnp.mean(lse - x_t)
    return ce_mean + jnp.asarray(loss_reg, jnp.float32).reshape(())


def ce_with_reg_loss_forward(data, target):
    """Mirrors CE_with_RegLoss.forward(data, target) with data = (logits, reg)."""
    return ce_with_reg_loss(data[0], target, data[1])


def _reference(logits, target, loss_reg):
    logp = jax.nn.log_softmax(logits.astype(jnp.float32), axis=-1)
    nll = -jnp.take_along_axis(logp, target[:, None].astype(jnp.int32), axis=-1)[:, 0]
    return jnp.mean(nll) + jnp.asarray(loss_reg, jnp.float32)


if __name__ == "__main__":
    key = jax.random.PRNGKey(0)
    keys = jax.random.split(key, 7)

    # Case 1: small single-tile path (batch=8, classes=32), module-style call.
    N1, C1 = 8, 32
    logits1 = jax.random.normal(keys[0], (N1, C1), dtype=jnp.float32)
    target1 = jax.random.randint(keys[1], (N1,), 0, C1, dtype=jnp.int32)
    reg1 = jax.random.uniform(keys[2], (), dtype=jnp.float32)
    out1 = jax.block_until_ready(ce_with_reg_loss_forward((logits1, reg1), target1))
    ref1 = _reference(logits1, target1, reg1)
    assert jnp.allclose(out1, ref1, atol=1e-5, rtol=1e-5), (out1, ref1)

    # Case 2: tiled online-LSE path with ragged class tile (300 % 128 != 0) and
    # a partial row tile (37 % 16 != 0) -- exercises the in-kernel masking.
    N2, C2 = 37, 300
    logits2 = jax.random.normal(keys[3], (N2, C2), dtype=jnp.float32)
    target2 = jax.random.randint(keys[4], (N2,), 0, C2, dtype=jnp.int32)
    reg2 = jnp.float32(0.25)
    out2 = jax.block_until_ready(
        ce_with_reg_loss(logits2, target2, reg2, tn=16, tc_max=128))
    ref2 = _reference(logits2, target2, reg2)
    assert jnp.allclose(out2, ref2, atol=1e-4, rtol=1e-4), (out2, ref2)

    # Case 3: bf16 logits (16-row sublane alignment) with ragged tiles.
    N3, C3 = 19, 160
    logits3 = jax.random.normal(keys[5], (N3, C3), dtype=jnp.float32).astype(jnp.bfloat16)
    target3 = jax.random.randint(keys[6], (N3,), 0, C3, dtype=jnp.int32)
    reg3 = jnp.float32(-0.5)
    out3 = jax.block_until_ready(
        ce_with_reg_loss(logits3, target3, reg3, tn=16, tc_max=128))
    ref3 = _reference(logits3, target3, reg3)
    assert jnp.allclose(out3, ref3, atol=1e-4, rtol=1e-4), (out3, ref3)

    print("KERNEL_OK")
</pallas_src>

<mosaic_0001>
module attributes {stable_mosaic.version = 11 : i64} {
  func.func @_lse_rows_kernel(%arg0: i32, %arg1: i32, %arg2: memref<8x32xf32, #tpu.memory_space<vmem>>, %arg3: memref<8x128xf32, #tpu.memory_space<vmem>>, %arg4: memref<8x1xf32, #tpu.memory_space<vmem>>, %arg5: memref<8x1xf32, #tpu.memory_space<vmem>>) attributes {dimension_semantics = [#tpu.dimension_semantics<parallel>, #tpu.dimension_semantics<arbitrary>], iteration_bounds = array<i64: 1, 1>, scalar_prefetch = 0 : i64, scratch_operands = 2 : i64, tpu.core_type = #tpu.core_type<tc>, window_params = [{transform_indices = @transform_0, window_bounds = array<i64: 8, 32>}, {transform_indices = @transform_1, window_bounds = array<i64: 8, 128>}]} {
    %c0_i32 = arith.constant 0 : i32
    %0 = arith.cmpi eq, %arg1, %c0_i32 : i32
    %1 = arith.extui %0 : i1 to i32
    %c0_i32_0 = arith.constant 0 : i32
    %2 = arith.cmpi ne, %1, %c0_i32_0 : i32
    scf.if %2 {
      %cst_15 = arith.constant 0xFF800000 : f32
      %24 = vector.broadcast %cst_15 : f32 to vector<8x1xf32>
      %c0_16 = arith.constant 0 : index
      %c0_17 = arith.constant 0 : index
      %25 = vector.load %arg4[%c0_16, %c0_17] : memref<8x1xf32, #tpu.memory_space<vmem>>, vector<8x1xf32>
      tpu.vector_store %arg4[%c0_16, %c0_17], %24 {strides = array<i32>} : memref<8x1xf32, #tpu.memory_space<vmem>>, vector<8x1xf32>,
      %cst_18 = arith.constant 0.000000e+00 : f32
      %26 = vector.broadcast %cst_18 : f32 to vector<8x1xf32>
      %c0_19 = arith.constant 0 : index
      %c0_20 = arith.constant 0 : index
      %27 = vector.load %arg5[%c0_19, %c0_20] : memref<8x1xf32, #tpu.memory_space<vmem>>, vector<8x1xf32>
      tpu.vector_store %arg5[%c0_19, %c0_20], %26 {strides = array<i32>} : memref<8x1xf32, #tpu.memory_space<vmem>>, vector<8x1xf32>,
    } else {
    }
    %c0 = arith.constant 0 : index
    %c0_1 = arith.constant 0 : index
    %3 = vector.load %arg2[%c0, %c0_1] : memref<8x32xf32, #tpu.memory_space<vmem>>, vector<8x32xf32>
    %cst = arith.constant dense<0xFF800000> : vector<8xf32>
    %4 = vector.multi_reduction <maximumf>, %3, %cst [1] : vector<8x32xf32> to vector<8xf32>
    %5 = vector.shape_cast %4 : vector<8xf32> to vector<8x1xf32>
    %c0_2 = arith.constant 0 : index
    %c0_3 = arith.constant 0 : index
    %6 = vector.load %arg4[%c0_2, %c0_3] : memref<8x1xf32, #tpu.memory_space<vmem>>, vector<8x1xf32>
    %7 = arith.maximumf %6, %5 : vector<8x1xf32>
    %c0_4 = arith.constant 0 : index
    %c0_5 = arith.constant 0 : index
    %8 = vector.load %arg4[%c0_4, %c0_5] : memref<8x1xf32, #tpu.memory_space<vmem>>, vector<8x1xf32>
    %9 = arith.subf %8, %7 : vector<8x1xf32>
    %10 = math.exp %9 : vector<8x1xf32>
    %11 = vector.broadcast %7 : vector<8x1xf32> to vector<8x32xf32>
    %12 = arith.subf %3, %11 : vector<8x32xf32>
    %13 = math.exp %12 : vector<8x32xf32>
    %cst_6 = arith.constant dense<0.000000e+00> : vector<8xf32>
    %14 = vector.multi_reduction <add>, %13, %cst_6 [1] : vector<8x32xf32> to vector<8xf32>
    %15 = vector.shape_cast %14 : vector<8xf32> to vector<8x1xf32>
    %c0_7 = arith.constant 0 : index
    %c0_8 = arith.constant 0 : index
    %16 = vector.load %arg5[%c0_7, %c0_8] : memref<8x1xf32, #tpu.memory_space<vmem>>, vector<8x1xf32>
    %17 = arith.mulf %10, %16 : vector<8x1xf32>
    %18 = arith.addf %17, %15 : vector<8x1xf32>
    %c0_9 = arith.constant 0 : index
    %c0_10 = arith.constant 0 : index
    %19 = vector.load %arg5[%c0_9, %c0_10] : memref<8x1xf32, #tpu.memory_space<vmem>>, vector<8x1xf32>
    tpu.vector_store %arg5[%c0_9, %c0_10], %18 {strides = array<i32>} : memref<8x1xf32, #tpu.memory_space<vmem>>, vector<8x1xf32>,
    %c0_11 = arith.constant 0 : index
    %c0_12 = arith.constant 0 : index
    %20 = vector.load %arg4[%c0_11, %c0_12] : memref<8x1xf32, #tpu.memory_space<vmem>>, vector<8x1xf32>
    tpu.vector_store %arg4[%c0_11, %c0_12], %7 {strides = array<i32>} : memref<8x1xf32, #tpu.memory_space<vmem>>, vector<8x1xf32>,
    %c0_i32_13 = arith.constant 0 : i32
    %21 = arith.cmpi eq, %arg1, %c0_i32_13 : i32
    %22 = arith.extui %21 : i1 to i32
    %c0_i32_14 = arith.constant 0 : i32
    %23 = arith.cmpi ne, %22, %c0_i32_14 : i32
    scf.if %23 {
      %c0_15 = arith.constant 0 : index
      %c0_16 = arith.constant 0 : index
      %24 = vector.load %arg4[%c0_15, %c0_16] : memref<8x1xf32, #tpu.memory_space<vmem>>, vector<8x1xf32>
      %c0_17 = arith.constant 0 : index
      %c0_18 = arith.constant 0 : index
      %25 = vector.load %arg5[%c0_17, %c0_18] : memref<8x1xf32, #tpu.memory_space<vmem>>, vector<8x1xf32>
      %26 = math.log %25 : vector<8x1xf32>
      %27 = arith.addf %24, %26 : vector<8x1xf32>
      %28 = vector.shape_cast %27 : vector<8x1xf32> to vector<8x1xf32>
      %29 = vector.broadcast %28 : vector<8x1xf32> to vector<8x128xf32>
      %c0_19 = arith.constant 0 : index
      %c0_20 = arith.constant 0 : index
      %30 = vector.load %arg3[%c0_19, %c0_20] : memref<8x128xf32, #tpu.memory_space<vmem>>, vector<8x128xf32>
      tpu.vector_store %arg3[%c0_19, %c0_20], %29 {strides = array<i32>} : memref<8x128xf32, #tpu.memory_space<vmem>>, vector<8x128xf32>,
    } else {
    }
    return
  }
  func.func @transform_0(%arg0: i32, %arg1: i32) -> (i32, i32) {
    %c0_i32 = arith.constant 0 : i32
    return %arg0, %arg1 : i32, i32
  }
  func.func @transform_1(%arg0: i32, %arg1: i32) -> (i32, i32) {
    %c0_i32 = arith.constant 0 : i32
    %c0_i32_0 = arith.constant 0 : i32
    return %arg0, %c0_i32 : i32, i32
  }
}

</mosaic_0001>

<bundles_post_ra>
// kernel: tpu_custom_call.1
= control target key start
LH: loop header
LB: loop body
LE: loop exit
PB: predicated region body
PF: predicated region fallthrough
CT: control target
= control target key end

     0   :  { %6 = vsyncpa [#allocation5], 0  ;;  %s190_s0 = inlined_call_operand.hbm [shape: f32[8,32], index: 0, kind: input, shape index: {}]   ;;  %s191_s1 = inlined_call_operand.hbm [shape: f32[8,128], index: 1, kind: output, shape index: {}]  }
   0x1   :  { %7 = vsyncpa [#allocation6], 0  ;;  %s145_s6 = smov [#allocation4]   ;;  %s97_s10 = scalar_lea.hbm %s190_s0, 128 }
   0x2   :  { %s14_s7 = sshll.u32 %s145_s6, 4  ;;  %p98_p0 = scmp.ne.s32.totalorder %s190_s0, %s97_s10  ;;  %s15_s7 = int_to_ptr.vmem [resolvable:$true] %s14_s7 }
   0x3   :  { %p101_p1 = scmp.lt.u32.totalorder %s97_s10, %s190_s0 }
   0x5   :  { %p103_p2 = pnand %p101_p1, %p98_p0 }
   0x7   :  { %106 = shalt.err (!%p103_p2)
}
   0x8   :  { %s107_s15 = scalar_lea.vmem %s15_s7, 128  ;;  %p112_p4 = scmp.lt.s32.totalorder %s15_s7, %s15_s7 }
   0x9   :  { %p108_p3 = scmp.ne.s32.totalorder %s15_s7, %s107_s15  ;;  %p113_p5 = scmp.lt.s32.totalorder %s107_s15, %s107_s15 }
   0xb   :  { %p114_p6 = por %p113_p5, %p112_p4 }
   0xd   :  { %p115_p7 = pnand %p114_p6, %p108_p3 }
   0xf   :  { %118 = shalt.err (!%p115_p7)
}
  0x10   :  { %17 = dma.hbm_to_vmem [thread:$0]  %s190_s0, 128, %s15_s7, [#allocation5]  }
  0x11   :  { %141 = dma.done.wait [#allocation5], 128  }
  0x12   :  { %142 = vsyncadd [#allocation5], 4294967168  ;;  %vm25_vm0 = vcmask 7168   ;;  %v146_v0 = vmov -inf   ;;  %vm29_vm1 = vcmask 261120   ;;  %v28_v1 = vld [vmem:[#allocation4] sm:$0xff] }
  0x13   :  { %26 = vst.msk [vmem:[#allocation2] sm:$0xff] %vm25_vm0, %v146_v0  ;;  %v30_v2 = vsel %vm29_vm1, %v28_v1, -inf  ;;  %v147_v3 = vmov 0   ;;  %v148_v4 = vmov 0.0   ;;  %s149_s0 = smov [#allocation7]  }
  0x14   :  { %31 = vmax.xlane.f32.xlu0 %v30_v2  ;;  %90 = vset.pattern.permute.xlu1 %v147_v3  ;;  %27 = vst.msk [vmem:[#allocation3] sm:$0xff] %vm25_vm0, %v148_v4  ;;  %s75_s18 = sshll.u32 %s149_s0, 4  ;;  %s76_s18 = int_to_ptr.vmem [resolvable:$true] %s75_s18 }
  0x15   :  { %89 = vset.pattern.permute.xlu0 %v147_v3  ;;  %s119_s19 = scalar_lea.vmem %s76_s18, 128  ;;  %p124_p9 = scmp.lt.s32.totalorder %s76_s18, %s76_s18 }
  0x16   :  { %p120_p8 = scmp.ne.s32.totalorder %s76_s18, %s119_s19  ;;  %p125_p10 = scmp.lt.s32.totalorder %s119_s19, %s119_s19 }
  0x18   :  { %p126_p11 = por %p125_p10, %p124_p9 }
  0x1a   :  { %v33_v5 = vld [vmem:[#allocation2] sm:$0xff]  ;;  %p127_p12 = pnand %p126_p11, %p120_p8 }
  0x1b   :  { %v49_v16 = vld [vmem:[#allocation3] sm:$0xff] }
  0xa1   :  { %v32_v6 = vpop.xlane.xlu0 %31 }
  0xa2   :  { %v34_v7 = vmax.f32 %v33_v5, %v32_v6 }
  0xa4   :  { %v35_v8 = vsub.f32 %v33_v5, %v34_v7  ;;  %54 = vst.msk [vmem:[#allocation2] sm:$0xff] %vm25_vm0, %v34_v7  ;;  %40 = vperm.xlu0 %89, %v34_v7  }
  0xa6   :  { %v36_v14 = vmul.f32 1.442695, %v35_v8 }
  0xab   :  { %v58_v23 = vld [vmem:[#allocation2] sm:$0xff] }
 0x123   :  { %v41_v9 = vpop.permute.xlu0 %40 }
 0x124   :  { %v43_v10 = vsub.f32 %v28_v1, %v41_v9 }
 0x126   :  { %v44_v11 = vmul.f32 1.442695, %v43_v10 }
 0x128   :  { %91 = vpow2.f32 %v44_v11 }
 0x129   :  { %93 = vpow2.f32 %v36_v14 }
 0x132   :  { %v92_v12 = vpop.eup %91 }
 0x133   :  { %v46_v13 = vsel %vm29_vm1, %v92_v12, 0.0  ;;  %v94_v15 = vpop.eup %93 }
 0x134   :  { %47 = vadd.xlane.f32.xlu1 %v46_v13  ;;  %v50_v17 = vmul.f32 %v94_v15, %v49_v16 }
 0x1c1   :  { %v48_v18 = vpop.xlane.xlu1 %47 }
 0x1c2   :  { %v51_v19 = vadd.f32 %v50_v17, %v48_v18 }
 0x1c4   :  { %53 = vst.msk [vmem:[#allocation3] sm:$0xff] %vm25_vm0, %v51_v19 }
 0x1cb   :  { %v59_v20 = vld [vmem:[#allocation3] sm:$0xff] }
 0x1cc   :  { %95 = vlog2.f32 %v59_v20 }
 0x1d6   :  { %v96_v21 = vpop.eup %95 }
 0x1d7   :  { %v61_v22 = vmul.f32 0.6931472, %v96_v21 }
 0x1d9   :  { %v62_v24 = vadd.f32 %v61_v22, %v58_v23 }
 0x1db   :  { %65 = vperm.xlu1 %90, %v62_v24  }
 0x25a   :  { %v66_v25 = vpop.permute.xlu1 %65 }
 0x25b   :  { %68 = vst [vmem:[#allocation7] sm:$0xff] %v66_v25 }
 0x25c   :  { %130 = shalt.err (!%p127_p12)
}
 0x25d   :  { %s131_s22 = scalar_lea.hbm %s191_s1, 128 }
 0x25e   :  { %p132_p13 = scmp.ne.s32.totalorder %s191_s1, %s131_s22  ;;  %p135_p0 = scmp.lt.u32.totalorder %s131_s22, %s191_s1 }
 0x260   :  { %p137_p1 = pnand %p135_p0, %p132_p13 }
 0x262   :  { %140 = shalt.err (!%p137_p1)
}
 0x263   :  { %78 = dma.vmem_to_hbm [thread:$0]  %s76_s18, 128, %s191_s1, [#allocation6]  }
 0x264   :  { %143 = dma.done.wait [#allocation6], 128  }
 0x265   :  { %144 = vsyncadd [#allocation6], 4294967168 }
 0x266   :  { %82 = vsyncpa [#allocation5], 1 }
 0x267   :  { %83 = vsyncpa [#allocation6], 1 }

</bundles_post_ra>
